<compile_context>
chip_gen: v7x
topology: tpu7x:2x2x1
jax: 0.10.0
libtpu: 0.0.40
codegen_flags: <defaults>
</compile_context>

<pallas_src>
import jax
import jax.numpy as jnp
from jax.experimental import pallas as pl
from jax.experimental.pallas import tpu as pltpu


def _gelu_tanh(x):
    # GELU, tanh approximation (config.act_fun is assumed to be GELU).
    c = jnp.float32(0.7978845608028654)  # sqrt(2/pi)
    return 0.5 * x * (1.0 + jnp.tanh(c * (x + 0.044715 * x * x * x)))


def _mm_private_mid_kernel(x_ref, w_ref, b_ref, o_ref):
    """One (batch, L-tile) step.

    x_ref: (1, C, TL)  input columns for this (b, l-tile)     (VMEM)
    w_ref: (C, C)      block-diagonal grouped weight          (VMEM, reused)
    b_ref: (C, 1)      bias (f32)                             (VMEM, reused)
    o_ref: (1, C, TL)  output columns                         (VMEM)
    """
    x = x_ref[0]                                   # (C, TL)
    # Single dense MXU matmul over the full folded feature axis, f32 accumulate.
    y = jnp.dot(w_ref[...], x, preferred_element_type=jnp.float32)  # (C, TL)
    y = y + b_ref[...]                              # broadcast bias over TL
    y = _gelu_tanh(y)
    o_ref[0] = y.astype(o_ref.dtype)


def _pick_l_tile(length, cap=2048):
    """Largest 'nice' tile along L: prefer multiples of 128, then of 8."""
    for cand in (2048, 1024, 512, 256, 128, 64, 32, 16, 8):
        if cand <= cap and cand <= length and length % cand == 0:
            return cand
    # No friendly divisor: use the cap (or the whole length if small) and let
    # the wrapper pad L up to a multiple of the tile.
    return min(length, cap)


def mm_private_mid(x, weight, bias, num_modes):
    """Pallas implementation of MMPrivateMid.forward (eval mode).

    x:      (B, M*D, L) input (Conv1d layout), any float dtype (f32 / bf16).
    weight: (M*D, D, 1) grouped Conv1d weight (groups = M).
    bias:   (M*D,)      Conv1d bias.
    returns (B, M*D, L) in x.dtype.
    """
    B, C, L = x.shape
    M = int(num_modes)
    assert C % M == 0
    D = C // M
    assert weight.shape == (C, D, 1)
    assert bias.shape == (C,)

    in_dtype = x.dtype

    # --- Host-side weight folding: block-diagonal (C, C) grouped weight.
    #   W_bd[m*D + o, n*D + i] = delta(m, n) * weight[m*D + o, i, 0]
    w_m = weight[:, :, 0].reshape(M, D, D)                       # (M, out, in)
    w_bd = jnp.einsum(
        "mn,moi->moni", jnp.eye(M, dtype=jnp.float32), w_m.astype(jnp.float32)
    ).reshape(C, C).astype(in_dtype)                              # MXU-native dtype
    b_col = bias.astype(jnp.float32).reshape(C, 1)                # f32 epilogue bias

    # --- Tile L; pad to a multiple of the tile if needed (rare path).
    tl = _pick_l_tile(L)
    l_tiles = pl.cdiv(L, tl)
    l_pad = l_tiles * tl
    x_in = x
    if l_pad != L:
        x_in = jnp.pad(x, ((0, 0), (0, 0), (0, l_pad - L)))

    grid = (B, l_tiles)

    out = pl.pallas_call(
        _mm_private_mid_kernel,
        out_shape=jax.ShapeDtypeStruct((B, C, l_pad), in_dtype),
        grid_spec=pltpu.PrefetchScalarGridSpec(
            num_scalar_prefetch=0,
            grid=grid,
            in_specs=[
                pl.BlockSpec((1, C, tl), lambda b, l: (b, 0, l)),  # x columns
                pl.BlockSpec((C, C), lambda b, l: (0, 0)),         # W_bd (resident)
                pl.BlockSpec((C, 1), lambda b, l: (0, 0)),          # bias (resident)
            ],
            out_specs=pl.BlockSpec((1, C, tl), lambda b, l: (b, 0, l)),
        ),
        compiler_params=pltpu.CompilerParams(
            dimension_semantics=("parallel", "parallel"),
        ),
    )(x_in, w_bd, b_col)

    if l_pad != L:
        out = out[:, :, :L]
    return out


def mm_private_mid_ref(x, weight, bias, num_modes):
    """Pure-JAX reference mirroring the PyTorch grouped Conv1d + GELU (eval mode)."""
    B, C, L = x.shape
    M = int(num_modes)
    D = C // M
    xm = x.astype(jnp.float32).reshape(B, M, D, L)
    wm = weight.astype(jnp.float32)[:, :, 0].reshape(M, D, D)     # (M, out, in)
    y = jnp.einsum("mod,bmdl->bmol", wm, xm) + bias.astype(jnp.float32).reshape(1, M, D, 1)
    y = _gelu_tanh(y)
    return y.reshape(B, C, L)


if __name__ == "__main__":
    # Module config: num_modes=4, feat_dim=32 -> feat_dim_allmode=128.
    B, M, D, L = 2, 4, 32, 16
    C = M * D

    key = jax.random.PRNGKey(0)
    kx, kw, kb = jax.random.split(key, 3)
    x = jax.random.normal(kx, (B, C, L), dtype=jnp.float32)
    weight = jax.random.normal(kw, (C, D, 1), dtype=jnp.float32) * 0.05
    bias = jax.random.normal(kb, (C,), dtype=jnp.float32) * 0.1

    out = mm_private_mid(x, weight, bias, num_modes=M)
    out = jax.block_until_ready(out)

    ref = mm_private_mid_ref(x, weight, bias, num_modes=M)
    assert out.shape == (B, C, L)
    assert jnp.allclose(out, ref, atol=1e-4, rtol=1e-4), "mismatch vs reference"

    print("KERNEL_OK")
</pallas_src>

<mosaic_0001>
module attributes {stable_mosaic.version = 11 : i64} {
  func.func @_mm_private_mid_kernel(%arg0: i32, %arg1: i32, %arg2: memref<1x128x16xf32, #tpu.memory_space<vmem>>, %arg3: memref<128x128xf32, #tpu.memory_space<vmem>>, %arg4: memref<128x1xf32, #tpu.memory_space<vmem>>, %arg5: memref<1x128x16xf32, #tpu.memory_space<vmem>>) attributes {dimension_semantics = [#tpu.dimension_semantics<parallel>, #tpu.dimension_semantics<parallel>], iteration_bounds = array<i64: 2, 1>, scalar_prefetch = 0 : i64, scratch_operands = 0 : i64, tpu.core_type = #tpu.core_type<tc>, window_params = [{transform_indices = @transform_0, window_bounds = array<i64: 1, 128, 16>}, {pipeline_mode = #tpu.pipeline_mode<synchronous>, transform_indices = @transform_1, window_bounds = array<i64: 128, 128>}, {pipeline_mode = #tpu.pipeline_mode<synchronous>, transform_indices = @transform_2, window_bounds = array<i64: 128, 1>}, {transform_indices = @transform_3, window_bounds = array<i64: 1, 128, 16>}]} {
    %c0 = arith.constant 0 : index
    %c0_0 = arith.constant 0 : index
    %c0_1 = arith.constant 0 : index
    %0 = vector.load %arg2[%c0, %c0_0, %c0_1] : memref<1x128x16xf32, #tpu.memory_space<vmem>>, vector<1x128x16xf32>
    %1 = vector.shape_cast %0 : vector<1x128x16xf32> to vector<128x16xf32>
    %c0_2 = arith.constant 0 : index
    %c0_3 = arith.constant 0 : index
    %2 = vector.load %arg3[%c0_2, %c0_3] : memref<128x128xf32, #tpu.memory_space<vmem>>, vector<128x128xf32>
    %cst = arith.constant dense<0.000000e+00> : vector<128x16xf32>
    %3 = tpu.matmul %2, %1, %cst {dimension_numbers = #tpu.dot_dimension_numbers<[1], [0], [0], [1], [0, 0, 1, 1], [], []>} : vector<128x128xf32>, vector<128x16xf32>, vector<128x16xf32> -> vector<128x16xf32>
    %c0_4 = arith.constant 0 : index
    %c0_5 = arith.constant 0 : index
    %4 = vector.load %arg4[%c0_4, %c0_5] : memref<128x1xf32, #tpu.memory_space<vmem>>, vector<128x1xf32>
    %5 = vector.broadcast %4 : vector<128x1xf32> to vector<128x16xf32>
    %6 = arith.addf %3, %5 : vector<128x16xf32>
    %cst_6 = arith.constant 5.000000e-01 : f32
    %7 = vector.broadcast %cst_6 : f32 to vector<128x16xf32>
    %8 = arith.mulf %7, %6 : vector<128x16xf32>
    %cst_7 = arith.constant 4.471500e-02 : f32
    %9 = vector.broadcast %cst_7 : f32 to vector<128x16xf32>
    %10 = arith.mulf %9, %6 : vector<128x16xf32>
    %11 = arith.mulf %10, %6 : vector<128x16xf32>
    %12 = arith.mulf %11, %6 : vector<128x16xf32>
    %13 = arith.addf %6, %12 : vector<128x16xf32>
    %cst_8 = arith.constant 0.797884583 : f32
    %14 = vector.broadcast %cst_8 : f32 to vector<128x16xf32>
    %15 = arith.mulf %14, %13 : vector<128x16xf32>
    %16 = math.tanh %15 : vector<128x16xf32>
    %cst_9 = arith.constant 1.000000e+00 : f32
    %17 = vector.broadcast %cst_9 : f32 to vector<128x16xf32>
    %18 = arith.addf %17, %16 : vector<128x16xf32>
    %19 = arith.mulf %8, %18 : vector<128x16xf32>
    %c0_10 = arith.constant 0 : index
    %c0_11 = arith.constant 0 : index
    %c0_12 = arith.constant 0 : index
    %20 = vector.load %arg5[%c0_10, %c0_11, %c0_12] : memref<1x128x16xf32, #tpu.memory_space<vmem>>, vector<1x128x16xf32>
    %21 = vector.shape_cast %20 : vector<1x128x16xf32> to vector<128x16xf32>
    %22 = vector.shape_cast %19 : vector<128x16xf32> to vector<1x128x16xf32>
    tpu.vector_store %arg5[%c0_10, %c0_11, %c0_12], %22 {strides = array<i32>} : memref<1x128x16xf32, #tpu.memory_space<vmem>>, vector<1x128x16xf32>,
    return
  }
  func.func @transform_0(%arg0: i32, %arg1: i32) -> (i32, i32, i32) {
    %c0_i32 = arith.constant 0 : i32
    %c0_i32_0 = arith.constant 0 : i32
    return %arg0, %c0_i32, %arg1 : i32, i32, i32
  }
  func.func @transform_1(%arg0: i32, %arg1: i32) -> (i32, i32) {
    %c0_i32 = arith.constant 0 : i32
    %c0_i32_0 = arith.constant 0 : i32
    %c0_i32_1 = arith.constant 0 : i32
    return %c0_i32, %c0_i32_0 : i32, i32
  }
  func.func @transform_2(%arg0: i32, %arg1: i32) -> (i32, i32) {
    %c0_i32 = arith.constant 0 : i32
    %c0_i32_0 = arith.constant 0 : i32
    %c0_i32_1 = arith.constant 0 : i32
    return %c0_i32, %c0_i32_0 : i32, i32
  }
  func.func @transform_3(%arg0: i32, %arg1: i32) -> (i32, i32, i32) {
    %c0_i32 = arith.constant 0 : i32
    %c0_i32_0 = arith.constant 0 : i32
    return %arg0, %c0_i32, %arg1 : i32, i32, i32
  }
}

</mosaic_0001>

<bundles_post_ra>
// kernel: tpu_custom_call.1
= control target key start
LH: loop header
LB: loop body
LE: loop exit
PB: predicated region body
PF: predicated region fallthrough
CT: control target
= control target key end

     0   :  { %s972_s12 = smov 0   ;;  %s974_s13 = smov 0   ;;  %s1287_s0 = inlined_call_operand.vmem [shape: f32[2,128,16], index: 0, kind: input, shape index: {}]   ;;  %s1288_s1 = inlined_call_operand.vmem [shape: f32[128,128], index: 1, kind: input, shape index: {}]   ;;  %s1289_s2 = inlined_call_operand.vmem [shape: f32[128,1], index: 2, kind: input, shape index: {}]   ;;  %s1290_s3 = inlined_call_operand.vmem [shape: f32[2,128,16], index: 3, kind: output, shape index: {}]  }
   0x1   :  { %s976_s14 = smov 0  }
   0x2 LB: > { %s25_s15 = sadd.s32 1, %s945_s13  ;;  %p723_p0 = scmp.ge.s32.totalorder %s949_s14, 1  ;;  %s949_s14 = sphi %s976_s14, %s13_s14   ;;  %s945_s13 = sphi %s974_s13, %s1292_s13   ;;  %s941_s12 = sphi %s972_s12, %s1291_s12  }
   0x3   : > { %p27_p1 = scmp.ge.s32.totalorder %s25_s15, 2  ;;  %p156_p2 = scmp.lt.s32.totalorder %s949_s14, 3 }
   0x5   : > { %s1294_s15 = smov (%p27_p1, %s25_s15), 0  ;;  %p157_p3 = pnand %p723_p0, %p156_p2 }
   0x6   : > { %p186_p4 = scmp.lt.s32.totalorder (!%p157_p3), %s941_s12, 1  ;;  %v218_v0 = vld [vmem:[%s1288_s1] sm:$0xff] (!%p157_p3)  ;;  %v951_v2 = vmov (!%p157_p3), 0   ;;  %v236_v3 = vld [vmem:[%s1289_s2 + $0x10] sm:$0xff] (!%p157_p3)  ;;  %v237_v14 = vld [vmem:[%s1289_s2 + $0x18] sm:$0xff] (!%p157_p3)  ;;  %vm619_vm0 = vcmask (!%p157_p3), 130048  }
   0x7   : > { %160 = sbr.rel (%p157_p3) target bundleno = 321 (0x141), region = 32  ;;  %v226_v1 = vld [vmem:[%s1288_s1 + $0x40] sm:$0xff] (!%p157_p3)  ;;  %796 = vmatprep.mubr.f32.mxu0 (!%p157_p3), %v218_v0  ;;  %894 = vset.pattern.permute.xlu1 (!%p157_p3), %v951_v2  ;;  %v235_v15 = vld [vmem:[%s1289_s2 + $0x8] sm:$0xff] (!%p157_p3)  ;;  %v241_v23 = vld [vmem:[%s1289_s2 + $0x38] sm:$0xff] (!%p157_p3) }
   0x8   : > { %808 = vmatprep.mubr.f32.mxu1 (!%p157_p3), %v226_v1  ;;  %893 = vset.pattern.permute.xlu0 (!%p157_p3), %v951_v2  ;;  %v234_v4 = vld [vmem:[%s1289_s2] sm:$0xff] (!%p157_p3)  ;;  %v239_v18 = vld [vmem:[%s1289_s2 + $0x28] sm:$0xff] (!%p157_p3)  ;;  %v240_v24 = vld [vmem:[%s1289_s2 + $0x30] sm:$0xff] (!%p157_p3) }
   0x9   : > { %262 = vperm.xlu1 (!%p157_p3), %894, %v236_v3   ;;  %252 = vperm.xlu0 (!%p157_p3), %893, %v234_v4   ;;  %v238_v19 = vld [vmem:[%s1289_s2 + $0x20] sm:$0xff] (!%p157_p3)  ;;  %v243_v28 = vld [vmem:[%s1289_s2 + $0x48] sm:$0xff] (!%p157_p3)  ;;  %v245_v33 = vld [vmem:[%s1289_s2 + $0x58] sm:$0xff] (!%p157_p3) }
   0xa   : > { %v242_v29 = vld [vmem:[%s1289_s2 + $0x40] sm:$0xff] (!%p157_p3)  ;;  %v244_v34 = vld [vmem:[%s1289_s2 + $0x50] sm:$0xff] (!%p157_p3)  ;;  %v247_v38 = vld [vmem:[%s1289_s2 + $0x68] sm:$0xff] (!%p157_p3) }
   0xb   : > { %v246_v39 = vld [vmem:[%s1289_s2 + $0x60] sm:$0xff] (!%p157_p3)  ;;  %v249_v41 = vld [vmem:[%s1289_s2 + $0x78] sm:$0xff] (!%p157_p3)  ;;  %v248_v42 = vld [vmem:[%s1289_s2 + $0x70] sm:$0xff] (!%p157_p3) }
   0xc   : > { %v219_v43 = vld [vmem:[%s1288_s1 + $0x8] sm:$0xff] (!%p157_p3)  ;;  %v220_v45 = vld [vmem:[%s1288_s1 + $0x10] sm:$0xff] (!%p157_p3)  ;;  %v221_v47 = vld [vmem:[%s1288_s1 + $0x18] sm:$0xff] (!%p157_p3) }
   0xd   : > { %267 = vperm.xlu1 (!%p157_p3), %894, %v237_v14   ;;  %257 = vperm.xlu0 (!%p157_p3), %893, %v235_v15   ;;  %v227_v44 = vld [vmem:[%s1288_s1 + $0x48] sm:$0xff] (!%p157_p3)  ;;  %v228_v46 = vld [vmem:[%s1288_s1 + $0x50] sm:$0xff] (!%p157_p3)  ;;  %v229_v48 = vld [vmem:[%s1288_s1 + $0x58] sm:$0xff] (!%p157_p3) }
   0xe   : > { %s1296_s12 = smov (!%p186_p4, %s941_s12), 1  ;;  %v222_v49 = vld [vmem:[%s1288_s1 + $0x20] sm:$0xff]  ;;  %v223_v51 = vld [vmem:[%s1288_s1 + $0x28] sm:$0xff]  ;;  %v224_v53 = vld [vmem:[%s1288_s1 + $0x30] sm:$0xff] }
   0xf   : > { %s730_s20 = sshll.u32 %s1296_s12, 7  ;;  %v230_v50 = vld [vmem:[%s1288_s1 + $0x60] sm:$0xff]  ;;  %v231_v52 = vld [vmem:[%s1288_s1 + $0x68] sm:$0xff]  ;;  %v232_v54 = vld [vmem:[%s1288_s1 + $0x70] sm:$0xff] }
  0x10   : > { %s1004_s23 = scalar_lea.vmem %s1287_s0, %s730_s20  ;;  %v225_v55 = vld [vmem:[%s1288_s1 + $0x38] sm:$0xff]  ;;  %s1208_s19 = scalar_lea.vmem %s1290_s3, %s730_s20 }
  0x11   : > { %v202_v5 = vld [vmem:[%s1004_s23] sm:$0xff]  ;;  %v203_v6 = vld [vmem:[%s1004_s23 + $0x8] sm:$0xff]  ;;  %v204_v7 = vld [vmem:[%s1004_s23 + $0x10] sm:$0xff]  ;;  %277 = vperm.xlu1 %894, %v239_v18   ;;  %272 = vperm.xlu0 %893, %v238_v19  }
  0x12   : > { %v820_v8 = vpack.c.bf16 %v203_v6, %v202_v5  ;;  %v205_v9 = vld [vmem:[%s1004_s23 + $0x18] sm:$0xff]  ;;  %v206_v11 = vld [vmem:[%s1004_s23 + $0x20] sm:$0xff]  ;;  %v207_v12 = vld [vmem:[%s1004_s23 + $0x28] sm:$0xff] }
  0x13   : > { %v824_v10 = vpack.c.bf16 %v205_v9, %v204_v7  ;;  %v828_v13 = vpack.c.bf16 %v207_v12, %v206_v11  ;;  %v208_v16 = vld [vmem:[%s1004_s23 + $0x30] sm:$0xff]  ;;  %v209_v17 = vld [vmem:[%s1004_s23 + $0x38] sm:$0xff]  ;;  %v210_v21 = vld [vmem:[%s1004_s23 + $0x40] sm:$0xff] }
  0x14   : > { %821 = vmatprep.subr.bf16.mxu0 %v820_v8  ;;  %852 = vmatprep.subr.bf16.mxu1 %v820_v8  ;;  %v832_v20 = vpack.c.bf16 %v209_v17, %v208_v16  ;;  %v211_v22 = vld [vmem:[%s1004_s23 + $0x48] sm:$0xff]  ;;  %v212_v26 = vld [vmem:[%s1004_s23 + $0x50] sm:$0xff]  ;;  %v213_v27 = vld [vmem:[%s1004_s23 + $0x58] sm:$0xff] }
  0x15   : > { %823 = vmatpush3.bf16.msra.mxu0 %v820_v8  ;;  %860 = vmatpush3.bf16.msra.mxu1 %v820_v8  ;;  %v836_v25 = vpack.c.bf16 %v211_v22, %v210_v21  ;;  %v840_v30 = vpack.c.bf16 %v213_v27, %v212_v26  ;;  %v214_v31 = vld [vmem:[%s1004_s23 + $0x60] sm:$0xff]  ;;  %v215_v32 = vld [vmem:[%s1004_s23 + $0x68] sm:$0xff]  ;;  %v216_v36 = vld [vmem:[%s1004_s23 + $0x70] sm:$0xff] }
  0x16   : > { %825 = vmatprep.subr.bf16.mxu0 %v824_v10  ;;  %853 = vmatprep.subr.bf16.mxu1 %v824_v10  ;;  %v844_v35 = vpack.c.bf16 %v215_v32, %v214_v31  ;;  %v217_v37 = vld [vmem:[%s1004_s23 + $0x78] sm:$0xff] }
  0x17   : > { %287 = vperm.xlu1 %894, %v241_v23   ;;  %282 = vperm.xlu0 %893, %v240_v24   ;;  %v848_v40 = vpack.c.bf16 %v217_v37, %v216_v36  ;;  %v233_v56 = vld [vmem:[%s1288_s1 + $0x78] sm:$0xff] }
  0x19   : > { %827 = vmatpush3.bf16.msra.mxu0 %v824_v10  ;;  %861 = vmatpush3.bf16.msra.mxu1 %v824_v10 }
  0x1a   : > { %829 = vmatprep.subr.bf16.mxu0 %v828_v13  ;;  %854 = vmatprep.subr.bf16.mxu1 %v828_v13 }
  0x1b   : > { %297 = vperm.xlu1 %894, %v243_v28   ;;  %292 = vperm.xlu0 %893, %v242_v29  }
  0x1d   : > { %831 = vmatpush3.bf16.msra.mxu0 %v828_v13  ;;  %862 = vmatpush3.bf16.msra.mxu1 %v828_v13 }
  0x1e   : > { %833 = vmatprep.subr.bf16.mxu0 %v832_v20  ;;  %855 = vmatprep.subr.bf16.mxu1 %v832_v20 }
  0x1f   : > { %307 = vperm.xlu1 %894, %v245_v33   ;;  %302 = vperm.xlu0 %893, %v244_v34  }
  0x21   : > { %835 = vmatpush3.bf16.msra.mxu0 %v832_v20  ;;  %863 = vmatpush3.bf16.msra.mxu1 %v832_v20 }
  0x22   : > { %837 = vmatprep.subr.bf16.mxu0 %v836_v25  ;;  %856 = vmatprep.subr.bf16.mxu1 %v836_v25 }
  0x23   : > { %317 = vperm.xlu1 %894, %v247_v38   ;;  %312 = vperm.xlu0 %893, %v246_v39  }
  0x25   : > { %839 = vmatpush3.bf16.msra.mxu0 %v836_v25  ;;  %864 = vmatpush3.bf16.msra.mxu1 %v836_v25 }
  0x26   : > { %841 = vmatprep.subr.bf16.mxu0 %v840_v30  ;;  %857 = vmatprep.subr.bf16.mxu1 %v840_v30 }
  0x27   : > { %327 = vperm.xlu1 %894, %v249_v41   ;;  %322 = vperm.xlu0 %893, %v248_v42  }
  0x29   : > { %843 = vmatpush3.bf16.msra.mxu0 %v840_v30  ;;  %865 = vmatpush3.bf16.msra.mxu1 %v840_v30 }
  0x2a   : > { %845 = vmatprep.subr.bf16.mxu0 %v844_v35  ;;  %858 = vmatprep.subr.bf16.mxu1 %v844_v35 }
  0x2d   : > { %847 = vmatpush3.bf16.msra.mxu0 %v844_v35  ;;  %866 = vmatpush3.bf16.msra.mxu1 %v844_v35 }
  0x2e   : > { %849 = vmatprep.subr.bf16.mxu0 %v848_v40  ;;  %859 = vmatprep.subr.bf16.mxu1 %v848_v40 }
  0x31   : > { %851 = vmatpush3.bf16.msra.mxu0 %v848_v40  ;;  %867 = vmatpush3.bf16.msra.mxu1 %v848_v40 }
  0x34   : > { %797 = vmatmul.mubr.f32.vlgmr.msra.gmra.mrb[0].mxu0 %v219_v43  ;;  %809 = vmatmul.mubr.f32.vlgmr.msra.gmra.mrb[0].mxu1 %v227_v44 }
  0x35   : > { %799 = vmatprep.mubr.f32.mxu0 %v220_v45  ;;  %811 = vmatprep.mubr.f32.mxu1 %v228_v46 }
  0x38   : > { %800 = vmatmul.mubr.f32.gmra.mrb[2].mxu0 %v221_v47  ;;  %812 = vmatmul.mubr.f32.gmra.mrb[2].mxu1 %v229_v48 }
  0x39   : > { %802 = vmatprep.mubr.f32.mxu0 %v222_v49  ;;  %814 = vmatprep.mubr.f32.mxu1 %v230_v50 }
  0x3c   : > { %803 = vmatmul.mubr.f32.gmra.mrb[4].mxu0 %v223_v51  ;;  %815 = vmatmul.mubr.f32.gmra.mrb[4].mxu1 %v231_v52 }
  0x3d   : > { %805 = vmatprep.mubr.f32.mxu0 %v224_v53  ;;  %817 = vmatprep.mubr.f32.mxu1 %v232_v54 }
  0x40   : > { %806 = vmatmul.mubr.f32.gmra.mrb[6].mxu0 %v225_v55  ;;  %818 = vmatmul.mubr.f32.gmra.mrb[6].mxu1 %v233_v56 }
  0x88   : > { %v263_v57 = vpop.permute.xlu1 %262  ;;  %v253_v58 = vpop.permute.xlu0 %252 }
  0x8c   : > { %v268_v59 = vpop.permute.xlu1 %267  ;;  %v258_v60 = vpop.permute.xlu0 %257 }
  0x90   : > { %v1112_v61 = vpop.permute.xlu1 %277  ;;  %v1114_v62 = vpop.permute.xlu0 %272 }
  0x96   : > { %v1116_v63 = vpop.permute.xlu1 %287  ;;  %v1118_v0 = vpop.permute.xlu0 %282 }
  0x9a   : > { %v298_v1 = vpop.permute.xlu1 %297  ;;  %v293_v2 = vpop.permute.xlu0 %292 }
  0x9e   : > { %v308_v13 = vpop.permute.xlu1 %307  ;;  %v303_v26 = vpop.permute.xlu0 %302 }
  0xa2   : > { %v318_v48 = vpop.permute.xlu1 %317 }
 0x107   : > { %v798_v3 = vpop.f32.mrb[0].mxu0  ;;  %v810_v4 = vpop.f32.mrb[0].mxu1 }
 0x108   : > { %v1120_v5 = vadd.f32 %v798_v3, %v258_v60  ;;  %v1122_v6 = vadd.f32 %v810_v4, %v298_v1  ;;  %v396_v7 = vpop.f32.mrb[1].mxu0  ;;  %v436_v8 = vpop.f32.mrb[1].mxu1 }
 0x109   : > { %v1124_v9 = vadd.f32 %v396_v7, %v253_v58  ;;  %v1126_v10 = vadd.f32 %v436_v8, %v293_v2 }
 0x10a   : > { %v492_v11 = vmul.f32 0.044715, %v1120_v5  ;;  %v500_v12 = vmul.f32 0.044715, %v1122_v6  ;;  %v476_v7 = vmul.f32 0.5, %v1120_v5 }
 0x10b   : > { %v491_v14 = vmul.f32 0.044715, %v1124_v9  ;;  %v499_v15 = vmul.f32 0.044715, %v1126_v10  ;;  %v801_v18 = vpop.f32.mrb[2].mxu0  ;;  %v813_v19 = vpop.f32.mrb[2].mxu1 }
 0x10c   : > { %v508_v16 = vmul.f32 %v492_v11, %v1120_v5  ;;  %v516_v17 = vmul.f32 %v500_v12, %v1122_v6  ;;  %v1136_v22 = vadd.f32 %v801_v18, %v268_v59  ;;  %v1138_v23 = vadd.f32 %v813_v19, %v308_v13  ;;  %v406_v24 = vpop.f32.mrb[3].mxu0  ;;  %v446_v25 = vpop.f32.mrb[3].mxu1 }
 0x10d   : > { %v507_v20 = vmul.f32 %v491_v14, %v1124_v9  ;;  %v515_v21 = vmul.f32 %v499_v15, %v1126_v10  ;;  %v1142_v29 = vadd.f32 %v406_v24, %v263_v57  ;;  %v1150_v38 = vadd.f32 %v446_v25, %v303_v26  ;;  %v313_v15 = vpop.permute.xlu0 %312 }
 0x10e   : > { %v524_v27 = vmul.f32 %v508_v16, %v1120_v5  ;;  %v532_v28 = vmul.f32 %v516_v17, %v1122_v6  ;;  %v494_v32 = vmul.f32 0.044715, %v1136_v22  ;;  %v502_v37 = vmul.f32 0.044715, %v1138_v23 }
 0x10f   : > { %v523_v30 = vmul.f32 %v507_v20, %v1124_v9  ;;  %v531_v31 = vmul.f32 %v515_v21, %v1126_v10  ;;  %v804_v33 = vpop.f32.mrb[4].mxu0  ;;  %v816_v34 = vpop.f32.mrb[4].mxu1  ;;  %v493_v47 = vmul.f32 0.044715, %v1142_v29  ;;  %v501_v55 = vmul.f32 0.044715, %v1150_v38 }
 0x110   : > { %v540_v35 = vadd.f32 %v524_v27, %v1120_v5  ;;  %v548_v36 = vadd.f32 %v532_v28, %v1122_v6  ;;  %v416_v39 = vpop.f32.mrb[5].mxu0  ;;  %v456_v40 = vpop.f32.mrb[5].mxu1  ;;  %v510_v43 = vmul.f32 %v494_v32, %v1136_v22  ;;  %v518_v46 = vmul.f32 %v502_v37, %v1138_v23 }
 0x111   : > { %v539_v41 = vadd.f32 %v523_v30, %v1124_v9  ;;  %v547_v42 = vadd.f32 %v531_v31, %v1126_v10  ;;  %v509_v54 = vmul.f32 %v493_v47, %v1142_v29  ;;  %v1163_v59 = vadd.f32 %v804_v33, %v1112_v61  ;;  %v328_v28 = vpop.permute.xlu1 %327 }
 0x112   : > { %v556_v44 = vmul.f32 0.7978846, %v540_v35  ;;  %v564_v45 = vmul.f32 0.7978846, %v548_v36  ;;  %v526_v51 = vmul.f32 %v510_v43, %v1136_v22  ;;  %v534_v53 = vmul.f32 %v518_v46, %v1138_v23 }
 0x113   : > { %v555_v49 = vmul.f32 0.7978846, %v539_v41  ;;  %v563_v50 = vmul.f32 0.7978846, %v547_v42  ;;  %v807_v52 = vpop.f32.mrb[6].mxu0  ;;  %v819_v56 = vpop.f32.mrb[6].mxu1  ;;  %v1165_v60 = vadd.f32 %v816_v34, %v318_v48  ;;  %v525_v3 = vmul.f32 %v509_v54, %v1142_v29 }
 0x114   : > { %895 = vtanh.f32 %v556_v44  ;;  %v426_v57 = vpop.f32.mrb[7].mxu0  ;;  %v542_v58 = vadd.f32 %v526_v51, %v1136_v22  ;;  %v1167_v1 = vpop.f32.mrb[7].mxu1  ;;  %v550_v2 = vadd.f32 %v534_v53, %v1138_v23  ;;  %v517_v4 = vmul.f32 %v501_v55, %v1150_v38 }
 0x115   : > { %897 = vtanh.f32 %v564_v45  ;;  %v496_v11 = vmul.f32 0.044715, %v1163_v59  ;;  %v484_v61 = vmul.f32 0.5, %v1122_v6  ;;  %v541_v13 = vadd.f32 %v525_v3, %v1142_v29 }
 0x116   : > { %899 = vtanh.f32 %v555_v49  ;;  %v558_v8 = vmul.f32 0.7978846, %v542_v58  ;;  %v566_v12 = vmul.f32 0.7978846, %v550_v2  ;;  %v533_v14 = vmul.f32 %v517_v4, %v1150_v38  ;;  %v323_v4 = vpop.permute.xlu0 %322 }
 0x117   : > { %901 = vtanh.f32 %v563_v50  ;;  %v512_v16 = vmul.f32 %v496_v11, %v1163_v59  ;;  %v504_v17 = vmul.f32 0.044715, %v1165_v60  ;;  %v1180_v5 = vadd.f32 %v416_v39, %v1114_v62 }
 0x118   : > { %903 = vtanh.f32 %v558_v8  ;;  %v557_v18 = vmul.f32 0.7978846, %v541_v13  ;;  %v549_v19 = vadd.f32 %v533_v14, %v1150_v38  ;;  %v1183_v20 = vadd.f32 %v456_v40, %v313_v15 }
 0x119   : > { %905 = vtanh.f32 %v566_v12  ;;  %v475_v6 = vmul.f32 0.5, %v1124_v9  ;;  %v528_v21 = vmul.f32 %v512_v16, %v1163_v59  ;;  %v520_v24 = vmul.f32 %v504_v17, %v1165_v60 }
 0x11a   : > { %v495_v25 = vmul.f32 0.044715, %v1180_v5  ;;  %v483_v26 = vmul.f32 0.5, %v1126_v10  ;;  %907 = vtanh.f32 %v557_v18  ;;  %v565_v27 = vmul.f32 0.7978846, %v549_v19 }
 0x11b   : > { %v503_v62 = vmul.f32 0.044715, %v1183_v20  ;;  %v544_v30 = vadd.f32 %v528_v21, %v1163_v59  ;;  %v536_v31 = vmul.f32 %v520_v24, %v1165_v60  ;;  %v1195_v32 = vadd.f32 %v807_v52, %v1116_v63 }
 0x11c   : > { %v511_v9 = vmul.f32 %v495_v25, %v1180_v5  ;;  %v478_v34 = vmul.f32 0.5, %v1136_v22  ;;  %909 = vtanh.f32 %v565_v27  ;;  %v1199_v35 = vadd.f32 %v819_v56, %v328_v28 }
 0x11d   : > { %v519_v10 = vmul.f32 %v503_v62, %v1183_v20  ;;  %v560_v39 = vmul.f32 0.7978846, %v544_v30  ;;  %v552_v40 = vadd.f32 %v536_v31, %v1165_v60  ;;  %v498_v43 = vmul.f32 0.044715, %v1195_v32 }
 0x11e   : > { %v896_v33 = vpop.eup %895  ;;  %v527_v41 = vmul.f32 %v511_v9, %v1180_v5  ;;  %v1213_v44 = vadd.f32 %v426_v57, %v1118_v0  ;;  %v486_v0 = vmul.f32 0.5, %v1138_v23  ;;  %v477_v8 = vmul.f32 0.5, %v1142_v29 }
 0x11f   : > { %v898_v36 = vpop.eup %897  ;;  %v588_v37 = vadd.f32 1.0, %v896_v33  ;;  %v535_v22 = vmul.f32 %v519_v10, %v1183_v20  ;;  %911 = vtanh.f32 %v560_v39  ;;  %v568_v48 = vmul.f32 0.7978846, %v552_v40 }
 0x120   : > { %v900_v42 = vpop.eup %899  ;;  %v596_v63 = vadd.f32 1.0, %v898_v36  ;;  %v543_v51 = vadd.f32 %v527_v41, %v1180_v5  ;;  %v514_v55 = vmul.f32 %v498_v43, %v1195_v32  ;;  %v506_v11 = vmul.f32 0.044715, %v1199_v35 }
 0x121   : > { %v902_v45 = vpop.eup %901  ;;  %v604_v46 = vmul.f32 %v588_v37, %v476_v7  ;;  %v587_v47 = vadd.f32 1.0, %v900_v42  ;;  %v551_v52 = vadd.f32 %v535_v22, %v1183_v20  ;;  %913 = vtanh.f32 %v568_v48 }
 0x122   : > { %v612_v49 = vmul.f32 %v596_v63, %v484_v61  ;;  %v595_v50 = vadd.f32 1.0, %v902_v45  ;;  %v904_v53 = vpop.eup %903  ;;  %v559_v2 = vmul.f32 0.7978846, %v543_v51  ;;  %v530_v23 = vmul.f32 %v514_v55, %v1195_v32 }
 0x123   : > { %621 = vst.msk [vmem:[%s1208_s19 + $0x8] sm:$0xff] %vm619_vm0, %v604_v46  ;;  %v603_v54 = vmul.f32 %v587_v47, %v475_v6  ;;  %v906_v56 = vpop.eup %905  ;;  %v590_v58 = vadd.f32 1.0, %v904_v53  ;;  %v567_v3 = vmul.f32 0.7978846, %v551_v52  ;;  %v497_v13 = vmul.f32 0.044715, %v1213_v44 }
 0x124   : > { %629 = vst.msk [vmem:[%s1208_s19 + $0x48] sm:$0xff] %vm619_vm0, %v612_v49  ;;  %v611_v57 = vmul.f32 %v595_v50, %v483_v26  ;;  %v598_v7 = vadd.f32 1.0, %v906_v56  ;;  %v908_v61 = vpop.eup %907  ;;  %915 = vtanh.f32 %v559_v2  ;;  %v1232_v14 = vadd.f32 %v1167_v1, %v323_v4 }
 0x125   : > { %620 = vst.msk [vmem:[%s1208_s19] sm:$0xff] %vm619_vm0, %v603_v54  ;;  %v606_v12 = vmul.f32 %v590_v58, %v478_v34  ;;  %v589_v16 = vadd.f32 1.0, %v908_v61  ;;  %917 = vtanh.f32 %v567_v3  ;;  %v546_v29 = vadd.f32 %v530_v23, %v1195_v32 }
 0x126   : > { %628 = vst.msk [vmem:[%s1208_s19 + $0x40] sm:$0xff] %vm619_vm0, %v611_v57  ;;  %v614_v15 = vmul.f32 %v598_v7, %v486_v0  ;;  %v910_v17 = vpop.eup %909  ;;  %v522_v18 = vmul.f32 %v506_v11, %v1199_v35  ;;  %v513_v19 = vmul.f32 %v497_v13, %v1213_v44  ;;  %v505_v6 = vmul.f32 0.044715, %v1232_v14 }
 0x127   : > { %623 = vst.msk [vmem:[%s1208_s19 + $0x18] sm:$0xff] %vm619_vm0, %v606_v12  ;;  %v605_v21 = vmul.f32 %v589_v16, %v477_v8  ;;  %v485_v1 = vmul.f32 0.5, %v1150_v38  ;;  %v597_v24 = vadd.f32 1.0, %v910_v17  ;;  %v562_v25 = vmul.f32 0.7978846, %v546_v29 }
 0x128   : > { %631 = vst.msk [vmem:[%s1208_s19 + $0x58] sm:$0xff] %vm619_vm0, %v614_v15  ;;  %v538_v26 = vmul.f32 %v522_v18, %v1199_v35  ;;  %v529_v27 = vmul.f32 %v513_v19, %v1213_v44  ;;  %v521_v62 = vmul.f32 %v505_v6, %v1232_v14  ;;  %v480_v31 = vmul.f32 0.5, %v1163_v59 }
 0x129   : > { %v912_v28 = vpop.eup %911  ;;  %622 = vst.msk [vmem:[%s1208_s19 + $0x10] sm:$0xff] %vm619_vm0, %v605_v21  ;;  %v613_v30 = vmul.f32 %v597_v24, %v485_v1  ;;  %919 = vtanh.f32 %v562_v25  ;;  %v488_v36 = vmul.f32 0.5, %v1165_v60  ;;  %v479_v43 = vmul.f32 0.5, %v1180_v5 }
 0x12a   : > { %v592_v9 = vadd.f32 1.0, %v912_v28  ;;  %v554_v38 = vadd.f32 %v538_v26, %v1199_v35  ;;  %v545_v33 = vadd.f32 %v529_v27, %v1213_v44  ;;  %v537_v34 = vmul.f32 %v521_v62, %v1232_v14 }
 0x12b   : > { %v914_v10 = vpop.eup %913  ;;  %630 = vst.msk [vmem:[%s1208_s19 + $0x50] sm:$0xff] %vm619_vm0, %v613_v30  ;;  %v487_v46 = vmul.f32 0.5, %v1183_v20  ;;  %v482_v5 = vmul.f32 0.5, %v1195_v32  ;;  %v490_v54 = vmul.f32 0.5, %v1199_v35  ;;  %v481_v55 = vmul.f32 0.5, %v1213_v44 }
 0x12c   : > { %v608_v37 = vmul.f32 %v592_v9, %v480_v31  ;;  %v600_v39 = vadd.f32 1.0, %v914_v10  ;;  %v570_v40 = vmul.f32 0.7978846, %v554_v38  ;;  %v561_v41 = vmul.f32 0.7978846, %v545_v33 }
 0x12d   : > { %v553_v59 = vadd.f32 %v537_v34, %v1232_v14  ;;  %v489_v3 = vmul.f32 0.5, %v1232_v14 }
 0x12e   : > { %v916_v42 = vpop.eup %915  ;;  %625 = vst.msk [vmem:[%s1208_s19 + $0x28] sm:$0xff] %vm619_vm0, %v608_v37  ;;  %v616_v63 = vmul.f32 %v600_v39, %v488_v36  ;;  %921 = vtanh.f32 %v570_v40 }
 0x12f   : > { %v918_v22 = vpop.eup %917  ;;  %v591_v45 = vadd.f32 1.0, %v916_v42  ;;  %923 = vtanh.f32 %v561_v41  ;;  %v569_v60 = vmul.f32 0.7978846, %v553_v59 }
 0x130   : > { %633 = vst.msk [vmem:[%s1208_s19 + $0x68] sm:$0xff] %vm619_vm0, %v616_v63  ;;  %v599_v47 = vadd.f32 1.0, %v918_v22 }
 0x131   : > { %v607_v48 = vmul.f32 %v591_v45, %v479_v43  ;;  %925 = vtanh.f32 %v569_v60 }
 0x132   : > { %v615_v49 = vmul.f32 %v599_v47, %v487_v46 }
 0x133   : > { %v920_v50 = vpop.eup %919  ;;  %624 = vst.msk [vmem:[%s1208_s19 + $0x20] sm:$0xff] %vm619_vm0, %v607_v48 }
 0x134   : > { %632 = vst.msk [vmem:[%s1208_s19 + $0x60] sm:$0xff] %vm619_vm0, %v615_v49  ;;  %v594_v51 = vadd.f32 1.0, %v920_v50 }
 0x136   : > { %v610_v52 = vmul.f32 %v594_v51, %v482_v5 }
 0x138   : > { %v922_v53 = vpop.eup %921  ;;  %627 = vst.msk [vmem:[%s1208_s19 + $0x38] sm:$0xff] %vm619_vm0, %v610_v52 }
 0x139   : > { %v924_v20 = vpop.eup %923  ;;  %v602_v0 = vadd.f32 1.0, %v922_v53 }
 0x13a   : > { %v593_v56 = vadd.f32 1.0, %v924_v20 }
 0x13b   : > { %v926_v57 = vpop.eup %925  ;;  %v618_v58 = vmul.f32 %v602_v0, %v490_v54 }
 0x13c   : > { %v609_v2 = vmul.f32 %v593_v56, %v481_v55  ;;  %v601_v32 = vadd.f32 1.0, %v926_v57 }
 0x13d   : > { %635 = vst.msk [vmem:[%s1208_s19 + $0x78] sm:$0xff] %vm619_vm0, %v618_v58 }
 0x13e   : > { %626 = vst.msk [vmem:[%s1208_s19 + $0x30] sm:$0xff] %vm619_vm0, %v609_v2  ;;  %v617_v4 = vmul.f32 %v601_v32, %v489_v3 }
 0x140   : > { %634 = vst.msk [vmem:[%s1208_s19 + $0x70] sm:$0xff] %vm619_vm0, %v617_v4 }
 0x141 PF: > { %s13_s14 = sadd.s32 1, %s949_s14   ;;  %s1291_s12 = smov %s945_s13 }
 0x142   : > { %p10_p5 = scmp.ge.s32.totalorder %s13_s14, 4   ;;  %s1292_s13 = smov %s1294_s15 }
 0x144   :  { %12 = sbr.rel (!%p10_p5) target bundleno = 2 (0x2), region = 62 }

</bundles_post_ra>
